<compile_context>
chip_gen: v7x
topology: tpu7x:2x2x1
jax: 0.10.0
libtpu: 0.0.40
codegen_flags: <defaults>
</compile_context>

<pallas_src>
import functools

import jax
import jax.numpy as jnp
from jax.experimental import pallas as pl
from jax.experimental.pallas import tpu as pltpu


# ----------------------------------------------------------------------------
# helpers
# ----------------------------------------------------------------------------
def _round_up(a: int, b: int) -> int:
    return (a + b - 1) // b * b


def _pick_tile(dim: int, target: int, granule: int) -> int:
    """Largest multiple of `granule` <= target that divides `dim`.

    `dim` must already be a multiple of `granule`.  (Awkward factorizations
    degrade toward `granule` -- correct, but a perf cliff; acceptable here
    because K/N are padded to x128 and M to the sublane granule.)
    """
    t = min(target, dim)
    t -= t % granule
    t = max(t, granule)
    while dim % t:
        t -= granule
    return t


@functools.lru_cache(maxsize=1)
def _vmem_capacity_bytes() -> int:
    """Physical VMEM of the current chip; conservative v7x default on failure."""
    try:
        cap = int(pltpu.get_tpu_info().vmem_capacity_bytes)
        if cap > 0:
            return cap
    except Exception:
        pass
    return 64 * 1024 * 1024  # v7x per-TensorCore VMEM (smallest of v5e/v6e/v7x)


# ----------------------------------------------------------------------------
# Pallas kernel: tiled  y = x @ W^T + b   (W passed pre-transposed as (K, N))
# Operands arrive already in the MXU dtype (bf16 by default); no in-kernel
# casts of the streamed tiles.
# ----------------------------------------------------------------------------
def _linear_kernel(x_ref, wt_ref, b_ref, o_ref, acc_ref):
    k = pl.program_id(2)

    @pl.when(k == 0)
    def _init():
        acc_ref[...] = jnp.zeros_like(acc_ref)

    acc_ref[...] += jnp.dot(x_ref[...], wt_ref[...],
                            preferred_element_type=jnp.float32)

    @pl.when(k == pl.num_programs(2) - 1)
    def _finalize():
        # bias added once, in the epilogue only (not per K step)
        o_ref[...] = (acc_ref[...] + b_ref[...].astype(jnp.float32)
                      ).astype(o_ref.dtype)


def pallas_linear(x, wt, b, *, out_dtype,
                  tm_target=512, tn_target=1024, tk_target=1024,
                  wt_buffer_count=2):
    """x: (M, K), wt: (K, N) (= W^T), b: (1, N).

    M must be a multiple of the sublane granule of x.dtype (16 for 2-byte,
    8 for 4-byte); K and N must be multiples of 128 (caller pre-pads).
    """
    m, k = x.shape
    k2, n = wt.shape
    assert k == k2 and b.shape == (1, n)
    op_bytes = jnp.dtype(x.dtype).itemsize
    granule_m = 16 if op_bytes == 2 else 8
    assert m % granule_m == 0 and k % 128 == 0 and n % 128 == 0, "caller must pre-pad"

    tm = _pick_tile(m, tm_target, granule_m)
    tk = _pick_tile(k, tk_target, 128)
    tn = _pick_tile(n, tn_target, 128)

    # v7x has 2 TensorCores per chip: make sure at least one "parallel" grid
    # axis has >= 2 blocks so dimension_semantics can shard across both cores
    # (neutral on v5e/v6e which have a single core).
    if (m // tm) == 1 and (n // tn) == 1:
        if tn > 128 and (tn // 2) % 128 == 0 and n % (tn // 2) == 0:
            tn //= 2
        elif tm > granule_m and (tm // 2) % granule_m == 0 and m % (tm // 2) == 0:
            tm //= 2

    grid = (m // tm, n // tn, k // tk)

    out_bytes = jnp.dtype(out_dtype).itemsize
    bias_bytes = jnp.dtype(b.dtype).itemsize
    # VMEM budget: double-buffered x/out/bias tiles, wt_buffer_count-deep wt,
    # plus the resident f32 accumulator; checked against physical capacity.
    vmem_est = (2 * tm * tk * op_bytes
                + wt_buffer_count * tk * tn * op_bytes
                + 2 * tm * tn * out_bytes
                + 2 * tn * bias_bytes
                + tm * tn * 4)
    cap = _vmem_capacity_bytes()
    vmem_limit = int(min(int(cap * 3 // 4), max(2 * vmem_est, 8 * 1024 * 1024)))
    vmem_limit = max(vmem_limit, int(vmem_est * 5 // 4))

    # Count re-streaming: W^T is read M/tm times, X is read N/tn times.
    cost = pl.CostEstimate(
        flops=2 * m * n * k,
        transcendentals=0,
        bytes_accessed=((m * k) * (n // tn) + (k * n) * (m // tm)) * op_bytes
                       + m * n * out_bytes + n * (m // tm) * bias_bytes,
    )

    wt_spec_kwargs = {}
    if wt_buffer_count != 2:
        # deepen pipelining on the large streamed operand only, if DMA exposed
        wt_spec_kwargs["pipeline_mode"] = pl.Buffered(wt_buffer_count)

    return pl.pallas_call(
        _linear_kernel,
        out_shape=jax.ShapeDtypeStruct((m, n), out_dtype),
        grid_spec=pltpu.PrefetchScalarGridSpec(
            num_scalar_prefetch=0,
            grid=grid,
            in_specs=[
                pl.BlockSpec((tm, tk), lambda i, j, kk: (i, kk)),
                pl.BlockSpec((tk, tn), lambda i, j, kk: (kk, j),
                             **wt_spec_kwargs),
                pl.BlockSpec((1, tn), lambda i, j, kk: (0, j)),
            ],
            out_specs=pl.BlockSpec((tm, tn), lambda i, j, kk: (i, j)),
            scratch_shapes=[pltpu.VMEM((tm, tn), jnp.float32)],
        ),
        compiler_params=pltpu.CompilerParams(
            dimension_semantics=("parallel", "parallel", "arbitrary"),
            vmem_limit_bytes=vmem_limit,
        ),
        cost_estimate=cost,
    )(x, wt, b)


# ----------------------------------------------------------------------------
# Functional forward: fetch (gather + unflatten) -> wrapped Linear -> release.
# Static layout info is baked in via functools.partial; params come in as an
# argument (nothing is cached in Python state), so this is safely jit-able.
# ----------------------------------------------------------------------------
def _zero3_linear_forward(shards, x, *, d_in, d_out, k_pad, n_pad,
                          compute_dtype, tm_target, tn_target, tk_target):
    # 1) fetch_params(): dist.all_gather of per-rank flat chunks.  On a single
    #    device the gather is just a reshape; un-flattening is a cheap view
    #    because the weight is stored pre-transposed/pre-padded as (K, N) in
    #    the compute dtype at shard-construction time (no per-forward w.T and
    #    no per-forward f32->bf16 cast of the weight).
    # TODO(synk): on a real multi-device mesh, fuse this all-gather into the
    # K loop of pallas_linear (per-K-step make_async_remote_copy of the next
    # rank's W^T chunk, double-buffered, collective_id + barrier semaphore)
    # so the gather hides behind the matmul instead of preceding it.
    buffer = shards.reshape(-1)
    w_numel = k_pad * n_pad
    wt = buffer[:w_numel].reshape(k_pad, n_pad)            # (K, N) == W^T
    b = buffer[w_numel:w_numel + n_pad].reshape(1, n_pad)  # (1, N)

    # 2) wrapped module forward: y = x @ W^T + b over the last dim.
    out_dtype = x.dtype
    lead = x.shape[:-1]
    x2d = x.reshape(-1, d_in)
    m = x2d.shape[0]
    granule_m = 16 if jnp.dtype(compute_dtype).itemsize == 2 else 8
    m_pad = _round_up(m, granule_m)
    if m_pad != m or k_pad != d_in:
        # pad only when needed; fuses with the dtype cast below (one HBM pass)
        x2d = jnp.pad(x2d, ((0, m_pad - m), (0, k_pad - d_in)))
    if x2d.dtype != compute_dtype:
        x2d = x2d.astype(compute_dtype)

    y_pad = pallas_linear(x2d, wt, b, out_dtype=out_dtype,
                          tm_target=tm_target, tn_target=tn_target,
                          tk_target=tk_target)
    y = y_pad[:m, :d_out].reshape(*lead, d_out)

    # 3) _cleanup_params(): nothing to do functionally -- the gathered padded
    #    params are temporaries local to this jitted call.
    return y


# ----------------------------------------------------------------------------
# Zero3Layer equivalent wrapping nn.Linear(D_IN, D_OUT)
# ----------------------------------------------------------------------------
class Zero3LinearLayer:
    TRAINING_PARAMS_IDX = 0

    def __init__(self, weight, bias, world_size, compute_dtype=jnp.bfloat16,
                 tm_target=512, tn_target=1024, tk_target=1024):
        """weight: (D_OUT, D_IN) (PyTorch convention), bias: (D_OUT,).

        compute_dtype is what the MXU is fed (bf16 by default: no v5e/v6e/v7x
        TPU has a native f32 matmul path); accumulation/output stay f32.
        """
        d_out, d_in = weight.shape
        self.world_size = world_size
        self.dtype = weight.dtype
        self.compute_dtype = compute_dtype
        self.d_in, self.d_out = d_in, d_out
        self._orig_shapes = [weight.shape, bias.shape]

        # Lane-dense / MXU-friendly shard layout, chosen once at construction:
        # weight stored pre-transposed (K, N), K and N padded to x128, in the
        # MXU compute dtype (halves shard size and all-gather volume).
        self.k_pad = _round_up(d_in, 128)
        self.n_pad = _round_up(d_out, 128)
        wt_pad = jnp.zeros((self.k_pad, self.n_pad), compute_dtype
                           ).at[:d_in, :d_out].set(weight.T.astype(compute_dtype))
        b_pad = jnp.zeros((self.n_pad,), compute_dtype
                          ).at[:d_out].set(bias.astype(compute_dtype))

        # _merge_and_pad_params: flatten+concat, pad to multiple of world_size.
        merged = jnp.concatenate([wt_pad.reshape(-1), b_pad])
        pad = (-merged.size) % world_size
        if pad:
            merged = jnp.concatenate(
                [merged, jnp.zeros((pad,), compute_dtype)])
        self.chunk_size = merged.size // world_size
        # dist.scatter equivalent: shards[r] is rank r's flat parameter chunk.
        self.shards = merged.reshape(world_size, self.chunk_size)

        # Whole forward (fetch + wrapped module + release) as one jitted call.
        self._jit_forward = jax.jit(functools.partial(
            _zero3_linear_forward, d_in=d_in, d_out=d_out,
            k_pad=self.k_pad, n_pad=self.n_pad, compute_dtype=compute_dtype,
            tm_target=tm_target, tn_target=tn_target, tk_target=tk_target))

    def get_trainable_chunk(self):
        return [self.shards]

    def forward(self, x):
        # fetch_params / _cleanup_params are folded into the jitted call;
        # params are passed functionally (no is_fetched Python caching).
        return self._jit_forward(self.shards, x)

    __call__ = forward

    # TODO(synk): backward hooks / reduce_scatter gradient backup and CUDA
    # stream plumbing are training-only and have no forward-pass equivalent.


# ----------------------------------------------------------------------------
# demo / correctness checks
# ----------------------------------------------------------------------------
if __name__ == "__main__":
    key = jax.random.PRNGKey(0)

    def run_case(B, S, D_IN, D_OUT, world_size, w_scale, atol, rtol, key,
                 **layer_kwargs):
        k_x, k_w, k_b = jax.random.split(key, 3)
        x = jax.random.normal(k_x, (B, S, D_IN), dtype=jnp.float32)
        weight = jax.random.normal(k_w, (D_OUT, D_IN), dtype=jnp.float32) * w_scale
        bias = jax.random.normal(k_b, (D_OUT,), dtype=jnp.float32) * 0.1
        layer = Zero3LinearLayer(weight, bias, world_size=world_size,
                                 **layer_kwargs)
        y = jax.block_until_ready(layer(x))
        y_ref = x @ weight.T + bias
        assert y.shape == (B, S, D_OUT)
        assert y.dtype == x.dtype
        assert jnp.allclose(y, y_ref, atol=atol, rtol=rtol), (
            f"mismatch for case {(B, S, D_IN, D_OUT)}: "
            f"max_err={float(jnp.max(jnp.abs(y - y_ref)))}")

    k1, k2, k3 = jax.random.split(key, 3)
    # tiny case (matches the module's toy shapes; exercises the padding path)
    run_case(2, 8, 32, 32, world_size=4, w_scale=0.1,
             atol=3e-2, rtol=3e-2, key=k1)
    # K-reduction case (tk override -> grid k-axis = 2; exercises accumulator
    # init/epilogue and the v7x >=2-parallel-blocks adjustment on N)
    run_case(2, 8, 1024, 256, world_size=8, w_scale=0.03,
             atol=5e-2, rtol=5e-2, key=k2, tk_target=512)
    # multi-tile M case (exercises the parallel M axis / megacore split)
    run_case(4, 128, 512, 384, world_size=4, w_scale=0.05,
             atol=5e-2, rtol=5e-2, key=k3)

    print("KERNEL_OK")
</pallas_src>

<mosaic_0001>
module attributes {stable_mosaic.version = 11 : i64} {
  func.func @_linear_kernel(%arg0: i32, %arg1: i32, %arg2: i32, %arg3: memref<16x128xbf16, #tpu.memory_space<vmem>>, %arg4: memref<128x128xbf16, #tpu.memory_space<vmem>>, %arg5: memref<1x128xbf16, #tpu.memory_space<vmem>>, %arg6: memref<16x128xf32, #tpu.memory_space<vmem>>, %arg7: memref<16x128xf32, #tpu.memory_space<vmem>>) attributes {dimension_semantics = [#tpu.dimension_semantics<parallel>, #tpu.dimension_semantics<parallel>, #tpu.dimension_semantics<arbitrary>], iteration_bounds = array<i64: 1, 1, 1>, scalar_prefetch = 0 : i64, scratch_operands = 1 : i64, tpu.core_type = #tpu.core_type<tc>, window_params = [{transform_indices = @transform_0, window_bounds = array<i64: 16, 128>}, {transform_indices = @transform_1, window_bounds = array<i64: 128, 128>}, {transform_indices = @transform_2, window_bounds = array<i64: 1, 128>}, {transform_indices = @transform_3, window_bounds = array<i64: 16, 128>}]} {
    %c0_i32 = arith.constant 0 : i32
    %0 = arith.cmpi eq, %arg2, %c0_i32 : i32
    %1 = arith.extui %0 : i1 to i32
    %c0_i32_0 = arith.constant 0 : i32
    %2 = arith.cmpi ne, %1, %c0_i32_0 : i32
    scf.if %2 {
      %cst_10 = arith.constant 0.000000e+00 : f32
      %12 = vector.broadcast %cst_10 : f32 to vector<16x128xf32>
      %c0_11 = arith.constant 0 : index
      %c0_12 = arith.constant 0 : index
      %13 = vector.load %arg7[%c0_11, %c0_12] : memref<16x128xf32, #tpu.memory_space<vmem>>, vector<16x128xf32>
      tpu.vector_store %arg7[%c0_11, %c0_12], %12 {strides = array<i32>} : memref<16x128xf32, #tpu.memory_space<vmem>>, vector<16x128xf32>,
    } else {
    }
    %c0 = arith.constant 0 : index
    %c0_1 = arith.constant 0 : index
    %3 = vector.load %arg7[%c0, %c0_1] : memref<16x128xf32, #tpu.memory_space<vmem>>, vector<16x128xf32>
    %c0_2 = arith.constant 0 : index
    %c0_3 = arith.constant 0 : index
    %4 = vector.load %arg3[%c0_2, %c0_3] : memref<16x128xbf16, #tpu.memory_space<vmem>>, vector<16x128xbf16>
    %c0_4 = arith.constant 0 : index
    %c0_5 = arith.constant 0 : index
    %5 = vector.load %arg4[%c0_4, %c0_5] : memref<128x128xbf16, #tpu.memory_space<vmem>>, vector<128x128xbf16>
    %cst = arith.constant dense<0.000000e+00> : vector<16x128xf32>
    %6 = tpu.matmul %4, %5, %cst {dimension_numbers = #tpu.dot_dimension_numbers<[1], [0], [0], [1], [0, 0, 1, 1], [], []>} : vector<16x128xbf16>, vector<128x128xbf16>, vector<16x128xf32> -> vector<16x128xf32>
    %7 = arith.addf %3, %6 : vector<16x128xf32>
    %c0_6 = arith.constant 0 : index
    %c0_7 = arith.constant 0 : index
    %8 = vector.load %arg7[%c0_6, %c0_7] : memref<16x128xf32, #tpu.memory_space<vmem>>, vector<16x128xf32>
    tpu.vector_store %arg7[%c0_6, %c0_7], %7 {strides = array<i32>} : memref<16x128xf32, #tpu.memory_space<vmem>>, vector<16x128xf32>,
    %c0_i32_8 = arith.constant 0 : i32
    %9 = arith.cmpi eq, %arg2, %c0_i32_8 : i32
    %10 = arith.extui %9 : i1 to i32
    %c0_i32_9 = arith.constant 0 : i32
    %11 = arith.cmpi ne, %10, %c0_i32_9 : i32
    scf.if %11 {
      %c0_10 = arith.constant 0 : index
      %c0_11 = arith.constant 0 : index
      %12 = vector.load %arg7[%c0_10, %c0_11] : memref<16x128xf32, #tpu.memory_space<vmem>>, vector<16x128xf32>
      %c0_12 = arith.constant 0 : index
      %c0_13 = arith.constant 0 : index
      %13 = vector.load %arg5[%c0_12, %c0_13] : memref<1x128xbf16, #tpu.memory_space<vmem>>, vector<1x128xbf16>
      %14 = arith.extf %13 : vector<1x128xbf16> to vector<1x128xf32>
      %15 = vector.broadcast %14 : vector<1x128xf32> to vector<16x128xf32>
      %16 = arith.addf %12, %15 : vector<16x128xf32>
      %c0_14 = arith.constant 0 : index
      %c0_15 = arith.constant 0 : index
      %17 = vector.load %arg6[%c0_14, %c0_15] : memref<16x128xf32, #tpu.memory_space<vmem>>, vector<16x128xf32>
      tpu.vector_store %arg6[%c0_14, %c0_15], %16 {strides = array<i32>} : memref<16x128xf32, #tpu.memory_space<vmem>>, vector<16x128xf32>,
    } else {
    }
    return
  }
  func.func @transform_0(%arg0: i32, %arg1: i32, %arg2: i32) -> (i32, i32) {
    %c0_i32 = arith.constant 0 : i32
    return %arg0, %arg2 : i32, i32
  }
  func.func @transform_1(%arg0: i32, %arg1: i32, %arg2: i32) -> (i32, i32) {
    %c0_i32 = arith.constant 0 : i32
    return %arg2, %arg1 : i32, i32
  }
  func.func @transform_2(%arg0: i32, %arg1: i32, %arg2: i32) -> (i32, i32) {
    %c0_i32 = arith.constant 0 : i32
    %c0_i32_0 = arith.constant 0 : i32
    return %c0_i32, %arg1 : i32, i32
  }
  func.func @transform_3(%arg0: i32, %arg1: i32, %arg2: i32) -> (i32, i32) {
    %c0_i32 = arith.constant 0 : i32
    return %arg0, %arg1 : i32, i32
  }
}

</mosaic_0001>

<bundles_post_ra>
// kernel: _zero3_linear_forward.1
= control target key start
LH: loop header
LB: loop body
LE: loop exit
PB: predicated region body
PF: predicated region fallthrough
CT: control target
= control target key end

     0   :  { %v208_v0 = vmov 0.0   ;;  %vm209_vm0 = vmmov 0   ;;  %v147_v10 = vlaneseq  ;;  %s266_s1 = inlined_call_operand.vmem [shape: bf16[128,128], index: 1, kind: input, shape index: {}]   ;;  %s267_s0 = inlined_call_operand.vmem [shape: bf16[16,128], index: 0, kind: input, shape index: {}]   ;;  %s268_s2 = inlined_call_operand.vmem [shape: bf16[1,128], index: 2, kind: input, shape index: {}]   ;;  %s269_s3 = inlined_call_operand.vmem [shape: f32[16,128], index: 3, kind: output, shape index: {}]  }
   0x1   :  { %177 = vmatprep.subr.bf16.mxu0 %v208_v0  ;;  %v199_v1 = vld [vmem:[%s266_s1] sm:$0xff]   ;;  %193 = vmatprep.mubr.msk.bf16.mxu0 %vm209_vm0, %v208_v0  ;;  %v200_v2 = vld [vmem:[%s266_s1 + $0x8] sm:$0xff]   ;;  %v201_v3 = vld [vmem:[%s266_s1 + $0x10] sm:$0xff]  }
   0x2   :  { %178 = vmatpush3.bf16.msra.mxu0 %v199_v1  ;;  %v202_v4 = vld [vmem:[%s266_s1 + $0x18] sm:$0xff]   ;;  %v203_v5 = vld [vmem:[%s266_s1 + $0x20] sm:$0xff]   ;;  %v204_v6 = vld [vmem:[%s266_s1 + $0x28] sm:$0xff]   ;;  %v148_v11 = vshrl.u32 %v147_v10, 7 }
   0x3   :  { %179 = vmatprep.subr.bf16.mxu0 %v208_v0  ;;  %v205_v7 = vld [vmem:[%s266_s1 + $0x30] sm:$0xff]   ;;  %v206_v8 = vld [vmem:[%s266_s1 + $0x38] sm:$0xff]   ;;  %v207_v9 = vld [vmem:[%s267_s0] sm:$0xff]  }
   0x4   :  { %v145_v12 = vld [vmem:[%s268_s2] sm:$0x1]  ;;  %v149_v14 = vsub.s32 0, %v148_v11 }
   0x5   :  { %v146_v13 = vunpack.c.l.bf16 %v145_v12 }
   0x6   :  { %180 = vmatpush3.bf16.msra.mxu0 %v200_v2 }
   0x7   :  { %181 = vmatprep.subr.bf16.mxu0 %v208_v0  ;;  %v150_v15 = vrot.slane %v146_v13, %v149_v14 }
   0xa   :  { %182 = vmatpush3.bf16.msra.mxu0 %v201_v3 }
   0xb   :  { %183 = vmatprep.subr.bf16.mxu0 %v208_v0 }
   0xe   :  { %184 = vmatpush3.bf16.msra.mxu0 %v202_v4 }
   0xf   :  { %185 = vmatprep.subr.bf16.mxu0 %v208_v0 }
  0x12   :  { %186 = vmatpush3.bf16.msra.mxu0 %v203_v5 }
  0x13   :  { %187 = vmatprep.subr.bf16.mxu0 %v208_v0 }
  0x16   :  { %188 = vmatpush3.bf16.msra.mxu0 %v204_v6 }
  0x17   :  { %189 = vmatprep.subr.bf16.mxu0 %v208_v0 }
  0x1a   :  { %190 = vmatpush3.bf16.msra.mxu0 %v205_v7 }
  0x1b   :  { %191 = vmatprep.subr.bf16.mxu0 %v208_v0 }
  0x1e   :  { %192 = vmatpush3.bf16.msra.mxu0 %v206_v8 }
  0x21   :  { %194 = vmatmul.mubr.bf16.vlgmr.msra.gmra.mrb[0].mxu0 %v207_v9 }
  0xf4   :  { %v129_v16 = vpop.f32.mrb[0].mxu0 }
  0xf5   :  { %v151_v17 = vadd.f32 %v150_v15, %v129_v16  ;;  %v195_v18 = vpop.f32.mrb[1].mxu0 }
  0xf6   :  { %v132_v19 = vpop.f32.mrb[2].mxu0 }
  0xf7   :  { %153 = vst [vmem:[%s269_s3] sm:$0xff] %v151_v17  ;;  %v152_v20 = vadd.f32 %v150_v15, %v132_v19  ;;  %v196_v21 = vpop.f32.mrb[3].mxu0 }
  0xf9   :  { %154 = vst [vmem:[%s269_s3 + $0x8] sm:$0xff] %v152_v20 }

</bundles_post_ra>
